<compile_context>
chip_gen: v5e
topology: v5e:2x2
jax: 0.10.0
libtpu: 0.0.40
codegen_flags: <defaults>
</compile_context>

<pallas_src>
import jax
import jax.numpy as jnp
from jax.experimental import pallas as pl
from jax.experimental.pallas import tpu as pltpu

# ----- small, deterministic dims consistent with the module -----
B = 1        # "single sample" perturber
T = 8        # sequence length
D = 8        # input feature size
H = 32       # LSTM hidden size (bidirectional -> 2H into fc1); 4H = 128 lanes
FC_H = 16    # fc hidden width
C = 2        # number of logit classes
LANES = 128
assert 4 * H == LANES

# ----- row offsets inside the packed (N_ROWS, 128) weight slab (all 8-row aligned) -----
R_WIH_F = 0                     # (D, 4H)   forward input->gates, fused i|f|g|o
R_WHH_F = R_WIH_F + D           # (H, 4H)   forward hidden->gates
R_B_F   = R_WHH_F + H           # row 0:    (1,4H) forward bias (b_ih + b_hh)
R_WIH_B = R_B_F + 8             # (D, 4H)   reverse input->gates
R_WHH_B = R_WIH_B + D           # (H, 4H)   reverse hidden->gates (unused: h0 == 0)
R_B_B   = R_WHH_B + H           # row 0:    (1,4H) reverse bias
R_FC1_W = R_B_B + 8             # (2H, 128) fc1 weight, lanes [FC_H:] zero
R_FC1_B = R_FC1_W + 2 * H       # row 0:    (1,128) fc1 bias, lanes [FC_H:] zero
R_FC2_W = R_FC1_B + 8           # (128,128) fc2 weight, rows [FC_H:] and cols [C:] zero
R_FC2_B = R_FC2_W + LANES       # row 0:    (1,128) fc2 bias, lanes [C:] zero
N_ROWS  = R_FC2_B + 8           # 304 rows x 128 lanes x f32 ~= 152 KiB


def attacker_kernel(x_ref, pert_ref, w_ref, pert_out_ref, logits_ref):
    # ---- feature perturber: perturbed = feature + perturbation ----
    perturbed3 = x_ref[...] + pert_ref[...]          # (B, T, D); (1,T,D) broadcasts
    pert_out_ref[...] = perturbed3
    perturbed = perturbed3[0]                        # (T, D)

    # ---- fused LSTM weights (gate order i|f|g|o along the 4H = 128 lane axis) ----
    wih_f = w_ref[R_WIH_F:R_WIH_F + D, :]            # (D, 4H)
    whh_f = w_ref[R_WHH_F:R_WHH_F + H, :]            # (H, 4H)
    b_f   = w_ref[R_B_F:R_B_F + 1, :]                # (1, 4H)
    wih_b = w_ref[R_WIH_B:R_WIH_B + D, :]            # (D, 4H)
    b_b   = w_ref[R_B_B:R_B_B + 1, :]                # (1, 4H)

    # Hoisted input projection: one lane-dense (T, 4H) = (8, 128) matmul + bias.
    xw_f = jnp.dot(perturbed, wih_f, preferred_element_type=jnp.float32) + b_f

    def gates(pre):                                  # pre: (1, 128) fused pre-activation
        # One full-lane sigmoid pass (EUP exp + approx vrcp); tanh recomputed for g.
        sig = pl.reciprocal(1.0 + jnp.exp(-pre), approx=True)
        i = sig[:, 0:H]
        f = sig[:, H:2 * H]
        g = jnp.tanh(pre[:, 2 * H:3 * H])
        o = sig[:, 3 * H:4 * H]
        return i, f, g, o

    # ---- forward recurrence (T = 8, static unroll); only h @ whh_f is serial ----
    h_f = jnp.zeros((1, H), jnp.float32)
    c_f = jnp.zeros((1, H), jnp.float32)
    for t in range(T):
        pre = xw_f[t:t + 1, :] + jnp.dot(h_f, whh_f, preferred_element_type=jnp.float32)
        i, f, g, o = gates(pre)
        c_f = f * c_f + i * g
        h_f = o * jnp.tanh(c_f)

    # ---- reverse direction ----
    # PyTorch bi-LSTM: lstm_out[:, -1, H:] is the reverse cell's FIRST step, i.e. one
    # cell step on x[:, -1, :] from zero state (h0 @ whh_b == 0, f * c0 == 0), so one
    # fused-gate step with no hidden matmul is exact.
    # TODO(synk): if LSTMSun2018Logit reads h_n[1] (full reverse pass) instead of
    # lstm_out[:, -1, H:], the reverse direction must iterate over the whole sequence.
    pre_b = (jnp.dot(perturbed[T - 1:T, :], wih_b, preferred_element_type=jnp.float32)
             + b_b)
    i_b, _f_b, g_b, o_b = gates(pre_b)
    h_b = o_b * jnp.tanh(i_b * g_b)

    # ---- head: act_lstm = Tanh, Dropout(eval)=identity, fc1 -> ReLU -> fc2 logits ----
    # Split fc1 across directions to avoid a cross-lane concatenate.
    th_f = jnp.tanh(h_f)                             # (1, H)
    th_b = jnp.tanh(h_b)                             # (1, H)
    fc1_pre = (jnp.dot(th_f, w_ref[R_FC1_W:R_FC1_W + H, :],
                       preferred_element_type=jnp.float32)
               + jnp.dot(th_b, w_ref[R_FC1_W + H:R_FC1_W + 2 * H, :],
                         preferred_element_type=jnp.float32)
               + w_ref[R_FC1_B:R_FC1_B + 1, :])      # (1, 128); lanes >= FC_H are zero
    fc1 = jnp.maximum(fc1_pre, 0.0)                  # ReLU
    # fc2 weight rows >= FC_H and cols >= C are zero, so the padded lanes contribute
    # nothing and the (1, 128) logits store is unmasked / lane-dense.
    logits_ref[...] = (jnp.dot(fc1, w_ref[R_FC2_W:R_FC2_W + LANES, :],
                               preferred_element_type=jnp.float32)
                       + w_ref[R_FC2_B:R_FC2_B + 1, :])


@jax.jit
def adversarial_attacker_forward(x, perturbation, w_slab):
    vmem = pl.BlockSpec(memory_space=pltpu.MemorySpace.VMEM)
    pert_out, logits_pad = pl.pallas_call(
        attacker_kernel,
        out_shape=(jax.ShapeDtypeStruct((B, T, D), jnp.float32),   # perturbed_feature
                   jax.ShapeDtypeStruct((1, LANES), jnp.float32)), # lane-dense logits
        in_specs=[vmem, vmem, vmem],
        out_specs=(vmem, vmem),
    )(x, perturbation, w_slab)
    return pert_out, logits_pad[:, :C]


# ---------------- host-side weight packing (one lane-aligned f32 slab) ----------------
def _fuse_gates(w):      # (4, in, H) -> (in, 4H), gate order i|f|g|o
    return jnp.concatenate([w[0], w[1], w[2], w[3]], axis=-1)


def _fuse_bias(b):       # (4, 1, H) -> (1, 4H)
    return jnp.concatenate([b[0], b[1], b[2], b[3]], axis=-1)


def _pad_block(a, rows, cols=LANES):
    r, c = a.shape
    return jnp.pad(a, ((0, rows - r), (0, cols - c)))


def pack_params(p):
    blocks = [
        _fuse_gates(p["wih_f"]),                     # (8, 128)
        _fuse_gates(p["whh_f"]),                     # (32, 128)
        _pad_block(_fuse_bias(p["b_f"]), 8),         # (8, 128)
        _fuse_gates(p["wih_b"]),                     # (8, 128)
        _fuse_gates(p["whh_b"]),                     # (32, 128)  (kept for completeness)
        _pad_block(_fuse_bias(p["b_b"]), 8),         # (8, 128)
        _pad_block(p["fc1_w"], 2 * H),               # (64, 128)
        _pad_block(p["fc1_b"], 8),                   # (8, 128)
        _pad_block(p["fc2_w"], LANES),               # (128, 128)
        _pad_block(p["fc2_b"], 8),                   # (8, 128)
    ]
    slab = jnp.concatenate(blocks, axis=0).astype(jnp.float32)
    assert slab.shape == (N_ROWS, LANES)
    return slab


# ---------------- pure-JAX reference (same math, exact sigmoid) ----------------
def reference_forward(x, p):
    perturbed = x + p["perturbation"]

    def cell(x_t, h, c, wih, whh, b):
        def gate(k):
            return x_t @ wih[k] + h @ whh[k] + b[k]
        i = jax.nn.sigmoid(gate(0))
        f = jax.nn.sigmoid(gate(1))
        g = jnp.tanh(gate(2))
        o = jax.nn.sigmoid(gate(3))
        c_new = f * c + i * g
        return o * jnp.tanh(c_new), c_new

    h0 = jnp.zeros((B, H), jnp.float32)
    c0 = jnp.zeros((B, H), jnp.float32)
    h_f, c_f = h0, c0
    for t in range(T):
        h_f, c_f = cell(perturbed[:, t, :], h_f, c_f, p["wih_f"], p["whh_f"], p["b_f"])
    h_b, _ = cell(perturbed[:, T - 1, :], h0, c0, p["wih_b"], p["whh_b"], p["b_b"])
    lstm_last = jnp.tanh(jnp.concatenate([h_f, h_b], axis=-1))
    fc1 = jnp.maximum(lstm_last @ p["fc1_w"] + p["fc1_b"], 0.0)
    logits = fc1 @ p["fc2_w"] + p["fc2_b"]
    return perturbed, logits


def init_params(key):
    ks = jax.random.split(key, 11)
    s = 0.1
    return {
        # SingleSampleFeaturePerturber parameter (nonzero so the add is exercised)
        "perturbation": 0.05 * jax.random.normal(ks[0], (1, T, D), jnp.float32),
        # forward-direction LSTM (gate order i,f,g,o), weights pre-transposed to (in, H)
        "wih_f": s * jax.random.normal(ks[1], (4, D, H), jnp.float32),
        "whh_f": s * jax.random.normal(ks[2], (4, H, H), jnp.float32),
        "b_f":   s * jax.random.normal(ks[3], (4, 1, H), jnp.float32),
        # reverse-direction LSTM
        "wih_b": s * jax.random.normal(ks[4], (4, D, H), jnp.float32),
        "whh_b": s * jax.random.normal(ks[5], (4, H, H), jnp.float32),
        "b_b":   s * jax.random.normal(ks[6], (4, 1, H), jnp.float32),
        # FC head
        "fc1_w": s * jax.random.normal(ks[7], (2 * H, FC_H), jnp.float32),
        "fc1_b": s * jax.random.normal(ks[8], (1, FC_H), jnp.float32),
        "fc2_w": s * jax.random.normal(ks[9], (FC_H, C), jnp.float32),
        "fc2_b": s * jax.random.normal(ks[10], (1, C), jnp.float32),
    }


if __name__ == "__main__":
    key = jax.random.PRNGKey(0)
    k_x, k_p = jax.random.split(key)
    x = jax.random.normal(k_x, (B, T, D), jnp.float32)
    params = init_params(k_p)
    w_slab = pack_params(params)            # pack the 10 weight arrays once, host-side

    perturbed, logits = adversarial_attacker_forward(x, params["perturbation"], w_slab)
    jax.block_until_ready((perturbed, logits))

    ref_perturbed, ref_logits = reference_forward(x, params)
    assert perturbed.shape == (B, T, D) and logits.shape == (B, C)
    assert jnp.allclose(perturbed, ref_perturbed, atol=1e-5, rtol=1e-5)
    # approx=True reciprocal inside the in-kernel sigmoid -> slightly looser tolerance
    assert jnp.allclose(logits, ref_logits, atol=2e-3, rtol=2e-3)

    print("KERNEL_OK")
</pallas_src>

<mosaic_0001>
module attributes {stable_mosaic.version = 11 : i64} {
  func.func @attacker_kernel(%arg0: memref<1x8x8xf32, #tpu.memory_space<vmem>>, %arg1: memref<1x8x8xf32, #tpu.memory_space<vmem>>, %arg2: memref<304x128xf32, #tpu.memory_space<vmem>>, %arg3: memref<1x8x8xf32, #tpu.memory_space<vmem>>, %arg4: memref<1x128xf32, #tpu.memory_space<vmem>>) attributes {dimension_semantics = [], scalar_prefetch = 0 : i64, scratch_operands = 0 : i64, tpu.core_type = #tpu.core_type<tc>} {
    %c0 = arith.constant 0 : index
    %c0_0 = arith.constant 0 : index
    %c0_1 = arith.constant 0 : index
    %0 = vector.load %arg0[%c0, %c0_0, %c0_1] : memref<1x8x8xf32, #tpu.memory_space<vmem>>, vector<1x8x8xf32>
    %c0_2 = arith.constant 0 : index
    %c0_3 = arith.constant 0 : index
    %c0_4 = arith.constant 0 : index
    %1 = vector.load %arg1[%c0_2, %c0_3, %c0_4] : memref<1x8x8xf32, #tpu.memory_space<vmem>>, vector<1x8x8xf32>
    %2 = arith.addf %0, %1 : vector<1x8x8xf32>
    %c0_5 = arith.constant 0 : index
    %c0_6 = arith.constant 0 : index
    %c0_7 = arith.constant 0 : index
    %3 = vector.load %arg3[%c0_5, %c0_6, %c0_7] : memref<1x8x8xf32, #tpu.memory_space<vmem>>, vector<1x8x8xf32>
    tpu.vector_store %arg3[%c0_5, %c0_6, %c0_7], %2 {strides = array<i32>} : memref<1x8x8xf32, #tpu.memory_space<vmem>>, vector<1x8x8xf32>,
    %4 = vector.shape_cast %2 : vector<1x8x8xf32> to vector<8x8xf32>
    %c0_8 = arith.constant 0 : index
    %c0_9 = arith.constant 0 : index
    %5 = vector.load %arg2[%c0_8, %c0_9] : memref<304x128xf32, #tpu.memory_space<vmem>>, vector<8x128xf32>
    %c8 = arith.constant 8 : index
    %c0_10 = arith.constant 0 : index
    %6 = vector.load %arg2[%c8, %c0_10] : memref<304x128xf32, #tpu.memory_space<vmem>>, vector<32x128xf32>
    %c40 = arith.constant 40 : index
    %c0_11 = arith.constant 0 : index
    %7 = vector.load %arg2[%c40, %c0_11] : memref<304x128xf32, #tpu.memory_space<vmem>>, vector<1x128xf32>
    %c48 = arith.constant 48 : index
    %c0_12 = arith.constant 0 : index
    %8 = vector.load %arg2[%c48, %c0_12] : memref<304x128xf32, #tpu.memory_space<vmem>>, vector<8x128xf32>
    %c88 = arith.constant 88 : index
    %c0_13 = arith.constant 0 : index
    %9 = vector.load %arg2[%c88, %c0_13] : memref<304x128xf32, #tpu.memory_space<vmem>>, vector<1x128xf32>
    %cst = arith.constant dense<0.000000e+00> : vector<8x128xf32>
    %10 = tpu.matmul %4, %5, %cst {dimension_numbers = #tpu.dot_dimension_numbers<[1], [0], [0], [1], [0, 0, 1, 1], [], []>} : vector<8x8xf32>, vector<8x128xf32>, vector<8x128xf32> -> vector<8x128xf32>
    %11 = vector.broadcast %7 : vector<1x128xf32> to vector<8x128xf32>
    %12 = arith.addf %10, %11 : vector<8x128xf32>
    %cst_14 = arith.constant 0.000000e+00 : f32
    %13 = vector.broadcast %cst_14 : f32 to vector<1x32xf32>
    %cst_15 = arith.constant 0.000000e+00 : f32
    %14 = vector.broadcast %cst_15 : f32 to vector<1x32xf32>
    %15 = vector.extract_strided_slice %12 {offsets = [0, 0], sizes = [1, 128], strides = [1, 1]} : vector<8x128xf32> to vector<1x128xf32>
    %cst_16 = arith.constant dense<0.000000e+00> : vector<1x128xf32>
    %16 = tpu.matmul %13, %6, %cst_16 {dimension_numbers = #tpu.dot_dimension_numbers<[1], [0], [0], [1], [0, 0, 1, 1], [], []>} : vector<1x32xf32>, vector<32x128xf32>, vector<1x128xf32> -> vector<1x128xf32>
    %17 = arith.addf %15, %16 : vector<1x128xf32>
    %cst_17 = arith.constant 0.000000e+00 : f32
    %18 = vector.broadcast %cst_17 : f32 to vector<1x128xf32>
    %19 = arith.subf %18, %17 : vector<1x128xf32>
    %20 = math.exp %19 : vector<1x128xf32>
    %cst_18 = arith.constant 1.000000e+00 : f32
    %21 = vector.broadcast %cst_18 : f32 to vector<1x128xf32>
    %22 = arith.addf %21, %20 : vector<1x128xf32>
    %23 = tpu.reciprocal %22 {approx = true} : vector<1x128xf32> -> vector<1x128xf32>
    %24 = vector.extract_strided_slice %23 {offsets = [0, 0], sizes = [1, 32], strides = [1, 1]} : vector<1x128xf32> to vector<1x32xf32>
    %25 = vector.extract_strided_slice %23 {offsets = [0, 32], sizes = [1, 32], strides = [1, 1]} : vector<1x128xf32> to vector<1x32xf32>
    %26 = vector.extract_strided_slice %17 {offsets = [0, 64], sizes = [1, 32], strides = [1, 1]} : vector<1x128xf32> to vector<1x32xf32>
    %27 = math.tanh %26 : vector<1x32xf32>
    %28 = vector.extract_strided_slice %23 {offsets = [0, 96], sizes = [1, 32], strides = [1, 1]} : vector<1x128xf32> to vector<1x32xf32>
    %29 = arith.mulf %25, %14 : vector<1x32xf32>
    %30 = arith.mulf %24, %27 : vector<1x32xf32>
    %31 = arith.addf %29, %30 : vector<1x32xf32>
    %32 = math.tanh %31 : vector<1x32xf32>
    %33 = arith.mulf %28, %32 : vector<1x32xf32>
    %34 = vector.extract_strided_slice %12 {offsets = [1, 0], sizes = [1, 128], strides = [1, 1]} : vector<8x128xf32> to vector<1x128xf32>
    %cst_19 = arith.constant dense<0.000000e+00> : vector<1x128xf32>
    %35 = tpu.matmul %33, %6, %cst_19 {dimension_numbers = #tpu.dot_dimension_numbers<[1], [0], [0], [1], [0, 0, 1, 1], [], []>} : vector<1x32xf32>, vector<32x128xf32>, vector<1x128xf32> -> vector<1x128xf32>
    %36 = arith.addf %34, %35 : vector<1x128xf32>
    %cst_20 = arith.constant 0.000000e+00 : f32
    %37 = vector.broadcast %cst_20 : f32 to vector<1x128xf32>
    %38 = arith.subf %37, %36 : vector<1x128xf32>
    %39 = math.exp %38 : vector<1x128xf32>
    %cst_21 = arith.constant 1.000000e+00 : f32
    %40 = vector.broadcast %cst_21 : f32 to vector<1x128xf32>
    %41 = arith.addf %40, %39 : vector<1x128xf32>
    %42 = tpu.reciprocal %41 {approx = true} : vector<1x128xf32> -> vector<1x128xf32>
    %43 = vector.extract_strided_slice %42 {offsets = [0, 0], sizes = [1, 32], strides = [1, 1]} : vector<1x128xf32> to vector<1x32xf32>
    %44 = vector.extract_strided_slice %42 {offsets = [0, 32], sizes = [1, 32], strides = [1, 1]} : vector<1x128xf32> to vector<1x32xf32>
    %45 = vector.extract_strided_slice %36 {offsets = [0, 64], sizes = [1, 32], strides = [1, 1]} : vector<1x128xf32> to vector<1x32xf32>
    %46 = math.tanh %45 : vector<1x32xf32>
    %47 = vector.extract_strided_slice %42 {offsets = [0, 96], sizes = [1, 32], strides = [1, 1]} : vector<1x128xf32> to vector<1x32xf32>
    %48 = arith.mulf %44, %31 : vector<1x32xf32>
    %49 = arith.mulf %43, %46 : vector<1x32xf32>
    %50 = arith.addf %48, %49 : vector<1x32xf32>
    %51 = math.tanh %50 : vector<1x32xf32>
    %52 = arith.mulf %47, %51 : vector<1x32xf32>
    %53 = vector.extract_strided_slice %12 {offsets = [2, 0], sizes = [1, 128], strides = [1, 1]} : vector<8x128xf32> to vector<1x128xf32>
    %cst_22 = arith.constant dense<0.000000e+00> : vector<1x128xf32>
    %54 = tpu.matmul %52, %6, %cst_22 {dimension_numbers = #tpu.dot_dimension_numbers<[1], [0], [0], [1], [0, 0, 1, 1], [], []>} : vector<1x32xf32>, vector<32x128xf32>, vector<1x128xf32> -> vector<1x128xf32>
    %55 = arith.addf %53, %54 : vector<1x128xf32>
    %cst_23 = arith.constant 0.000000e+00 : f32
    %56 = vector.broadcast %cst_23 : f32 to vector<1x128xf32>
    %57 = arith.subf %56, %55 : vector<1x128xf32>
    %58 = math.exp %57 : vector<1x128xf32>
    %cst_24 = arith.constant 1.000000e+00 : f32
    %59 = vector.broadcast %cst_24 : f32 to vector<1x128xf32>
    %60 = arith.addf %59, %58 : vector<1x128xf32>
    %61 = tpu.reciprocal %60 {approx = true} : vector<1x128xf32> -> vector<1x128xf32>
    %62 = vector.extract_strided_slice %61 {offsets = [0, 0], sizes = [1, 32], strides = [1, 1]} : vector<1x128xf32> to vector<1x32xf32>
    %63 = vector.extract_strided_slice %61 {offsets = [0, 32], sizes = [1, 32], strides = [1, 1]} : vector<1x128xf32> to vector<1x32xf32>
    %64 = vector.extract_strided_slice %55 {offsets = [0, 64], sizes = [1, 32], strides = [1, 1]} : vector<1x128xf32> to vector<1x32xf32>
    %65 = math.tanh %64 : vector<1x32xf32>
    %66 = vector.extract_strided_slice %61 {offsets = [0, 96], sizes = [1, 32], strides = [1, 1]} : vector<1x128xf32> to vector<1x32xf32>
    %67 = arith.mulf %63, %50 : vector<1x32xf32>
    %68 = arith.mulf %62, %65 : vector<1x32xf32>
    %69 = arith.addf %67, %68 : vector<1x32xf32>
    %70 = math.tanh %69 : vector<1x32xf32>
    %71 = arith.mulf %66, %70 : vector<1x32xf32>
    %72 = vector.extract_strided_slice %12 {offsets = [3, 0], sizes = [1, 128], strides = [1, 1]} : vector<8x128xf32> to vector<1x128xf32>
    %cst_25 = arith.constant dense<0.000000e+00> : vector<1x128xf32>
    %73 = tpu.matmul %71, %6, %cst_25 {dimension_numbers = #tpu.dot_dimension_numbers<[1], [0], [0], [1], [0, 0, 1, 1], [], []>} : vector<1x32xf32>, vector<32x128xf32>, vector<1x128xf32> -> vector<1x128xf32>
    %74 = arith.addf %72, %73 : vector<1x128xf32>
    %cst_26 = arith.constant 0.000000e+00 : f32
    %75 = vector.broadcast %cst_26 : f32 to vector<1x128xf32>
    %76 = arith.subf %75, %74 : vector<1x128xf32>
    %77 = math.exp %76 : vector<1x128xf32>
    %cst_27 = arith.constant 1.000000e+00 : f32
    %78 = vector.broadcast %cst_27 : f32 to vector<1x128xf32>
    %79 = arith.addf %78, %77 : vector<1x128xf32>
    %80 = tpu.reciprocal %79 {approx = true} : vector<1x128xf32> -> vector<1x128xf32>
    %81 = vector.extract_strided_slice %80 {offsets = [0, 0], sizes = [1, 32], strides = [1, 1]} : vector<1x128xf32> to vector<1x32xf32>
    %82 = vector.extract_strided_slice %80 {offsets = [0, 32], sizes = [1, 32], strides = [1, 1]} : vector<1x128xf32> to vector<1x32xf32>
    %83 = vector.extract_strided_slice %74 {offsets = [0, 64], sizes = [1, 32], strides = [1, 1]} : vector<1x128xf32> to vector<1x32xf32>
    %84 = math.tanh %83 : vector<1x32xf32>
    %85 = vector.extract_strided_slice %80 {offsets = [0, 96], sizes = [1, 32], strides = [1, 1]} : vector<1x128xf32> to vector<1x32xf32>
    %86 = arith.mulf %82, %69 : vector<1x32xf32>
    %87 = arith.mulf %81, %84 : vector<1x32xf32>
    %88 = arith.addf %86, %87 : vector<1x32xf32>
    %89 = math.tanh %88 : vector<1x32xf32>
    %90 = arith.mulf %85, %89 : vector<1x32xf32>
    %91 = vector.extract_strided_slice %12 {offsets = [4, 0], sizes = [1, 128], strides = [1, 1]} : vector<8x128xf32> to vector<1x128xf32>
    %cst_28 = arith.constant dense<0.000000e+00> : vector<1x128xf32>
    %92 = tpu.matmul %90, %6, %cst_28 {dimension_numbers = #tpu.dot_dimension_numbers<[1], [0], [0], [1], [0, 0, 1, 1], [], []>} : vector<1x32xf32>, vector<32x128xf32>, vector<1x128xf32> -> vector<1x128xf32>
    %93 = arith.addf %91, %92 : vector<1x128xf32>
    %cst_29 = arith.constant 0.000000e+00 : f32
    %94 = vector.broadcast %cst_29 : f32 to vector<1x128xf32>
    %95 = arith.subf %94, %93 : vector<1x128xf32>
    %96 = math.exp %95 : vector<1x128xf32>
    %cst_30 = arith.constant 1.000000e+00 : f32
    %97 = vector.broadcast %cst_30 : f32 to vector<1x128xf32>
    %98 = arith.addf %97, %96 : vector<1x128xf32>
    %99 = tpu.reciprocal %98 {approx = true} : vector<1x128xf32> -> vector<1x128xf32>
    %100 = vector.extract_strided_slice %99 {offsets = [0, 0], sizes = [1, 32], strides = [1, 1]} : vector<1x128xf32> to vector<1x32xf32>
    %101 = vector.extract_strided_slice %99 {offsets = [0, 32], sizes = [1, 32], strides = [1, 1]} : vector<1x128xf32> to vector<1x32xf32>
    %102 = vector.extract_strided_slice %93 {offsets = [0, 64], sizes = [1, 32], strides = [1, 1]} : vector<1x128xf32> to vector<1x32xf32>
    %103 = math.tanh %102 : vector<1x32xf32>
    %104 = vector.extract_strided_slice %99 {offsets = [0, 96], sizes = [1, 32], strides = [1, 1]} : vector<1x128xf32> to vector<1x32xf32>
    %105 = arith.mulf %101, %88 : vector<1x32xf32>
    %106 = arith.mulf %100, %103 : vector<1x32xf32>
    %107 = arith.addf %105, %106 : vector<1x32xf32>
    %108 = math.tanh %107 : vector<1x32xf32>
    %109 = arith.mulf %104, %108 : vector<1x32xf32>
    %110 = vector.extract_strided_slice %12 {offsets = [5, 0], sizes = [1, 128], strides = [1, 1]} : vector<8x128xf32> to vector<1x128xf32>
    %cst_31 = arith.constant dense<0.000000e+00> : vector<1x128xf32>
    %111 = tpu.matmul %109, %6, %cst_31 {dimension_numbers = #tpu.dot_dimension_numbers<[1], [0], [0], [1], [0, 0, 1, 1], [], []>} : vector<1x32xf32>, vector<32x128xf32>, vector<1x128xf32> -> vector<1x128xf32>
    %112 = arith.addf %110, %111 : vector<1x128xf32>
    %cst_32 = arith.constant 0.000000e+00 : f32
    %113 = vector.broadcast %cst_32 : f32 to vector<1x128xf32>
    %114 = arith.subf %113, %112 : vector<1x128xf32>
    %115 = math.exp %114 : vector<1x128xf32>
    %cst_33 = arith.constant 1.000000e+00 : f32
    %116 = vector.broadcast %cst_33 : f32 to vector<1x128xf32>
    %117 = arith.addf %116, %115 : vector<1x128xf32>
    %118 = tpu.reciprocal %117 {approx = true} : vector<1x128xf32> -> vector<1x128xf32>
    %119 = vector.extract_strided_slice %118 {offsets = [0, 0], sizes = [1, 32], strides = [1, 1]} : vector<1x128xf32> to vector<1x32xf32>
    %120 = vector.extract_strided_slice %118 {offsets = [0, 32], sizes = [1, 32], strides = [1, 1]} : vector<1x128xf32> to vector<1x32xf32>
    %121 = vector.extract_strided_slice %112 {offsets = [0, 64], sizes = [1, 32], strides = [1, 1]} : vector<1x128xf32> to vector<1x32xf32>
    %122 = math.tanh %121 : vector<1x32xf32>
    %123 = vector.extract_strided_slice %118 {offsets = [0, 96], sizes = [1, 32], strides = [1, 1]} : vector<1x128xf32> to vector<1x32xf32>
    %124 = arith.mulf %120, %107 : vector<1x32xf32>
    %125 = arith.mulf %119, %122 : vector<1x32xf32>
    %126 = arith.addf %124, %125 : vector<1x32xf32>
    %127 = math.tanh %126 : vector<1x32xf32>
    %128 = arith.mulf %123, %127 : vector<1x32xf32>
    %129 = vector.extract_strided_slice %12 {offsets = [6, 0], sizes = [1, 128], strides = [1, 1]} : vector<8x128xf32> to vector<1x128xf32>
    %cst_34 = arith.constant dense<0.000000e+00> : vector<1x128xf32>
    %130 = tpu.matmul %128, %6, %cst_34 {dimension_numbers = #tpu.dot_dimension_numbers<[1], [0], [0], [1], [0, 0, 1, 1], [], []>} : vector<1x32xf32>, vector<32x128xf32>, vector<1x128xf32> -> vector<1x128xf32>
    %131 = arith.addf %129, %130 : vector<1x128xf32>
    %cst_35 = arith.constant 0.000000e+00 : f32
    %132 = vector.broadcast %cst_35 : f32 to vector<1x128xf32>
    %133 = arith.subf %132, %131 : vector<1x128xf32>
    %134 = math.exp %133 : vector<1x128xf32>
    %cst_36 = arith.constant 1.000000e+00 : f32
    %135 = vector.broadcast %cst_36 : f32 to vector<1x128xf32>
    %136 = arith.addf %135, %134 : vector<1x128xf32>
    %137 = tpu.reciprocal %136 {approx = true} : vector<1x128xf32> -> vector<1x128xf32>
    %138 = vector.extract_strided_slice %137 {offsets = [0, 0], sizes = [1, 32], strides = [1, 1]} : vector<1x128xf32> to vector<1x32xf32>
    %139 = vector.extract_strided_slice %137 {offsets = [0, 32], sizes = [1, 32], strides = [1, 1]} : vector<1x128xf32> to vector<1x32xf32>
    %140 = vector.extract_strided_slice %131 {offsets = [0, 64], sizes = [1, 32], strides = [1, 1]} : vector<1x128xf32> to vector<1x32xf32>
    %141 = math.tanh %140 : vector<1x32xf32>
    %142 = vector.extract_strided_slice %137 {offsets = [0, 96], sizes = [1, 32], strides = [1, 1]} : vector<1x128xf32> to vector<1x32xf32>
    %143 = arith.mulf %139, %126 : vector<1x32xf32>
    %144 = arith.mulf %138, %141 : vector<1x32xf32>
    %145 = arith.addf %143, %144 : vector<1x32xf32>
    %146 = math.tanh %145 : vector<1x32xf32>
    %147 = arith.mulf %142, %146 : vector<1x32xf32>
    %148 = vector.extract_strided_slice %12 {offsets = [7, 0], sizes = [1, 128], strides = [1, 1]} : vector<8x128xf32> to vector<1x128xf32>
    %cst_37 = arith.constant dense<0.000000e+00> : vector<1x128xf32>
    %149 = tpu.matmul %147, %6, %cst_37 {dimension_numbers = #tpu.dot_dimension_numbers<[1], [0], [0], [1], [0, 0, 1, 1], [], []>} : vector<1x32xf32>, vector<32x128xf32>, vector<1x128xf32> -> vector<1x128xf32>
    %150 = arith.addf %148, %149 : vector<1x128xf32>
    %cst_38 = arith.constant 0.000000e+00 : f32
    %151 = vector.broadcast %cst_38 : f32 to vector<1x128xf32>
    %152 = arith.subf %151, %150 : vector<1x128xf32>
    %153 = math.exp %152 : vector<1x128xf32>
    %cst_39 = arith.constant 1.000000e+00 : f32
    %154 = vector.broadcast %cst_39 : f32 to vector<1x128xf32>
    %155 = arith.addf %154, %153 : vector<1x128xf32>
    %156 = tpu.reciprocal %155 {approx = true} : vector<1x128xf32> -> vector<1x128xf32>
    %157 = vector.extract_strided_slice %156 {offsets = [0, 0], sizes = [1, 32], strides = [1, 1]} : vector<1x128xf32> to vector<1x32xf32>
    %158 = vector.extract_strided_slice %156 {offsets = [0, 32], sizes = [1, 32], strides = [1, 1]} : vector<1x128xf32> to vector<1x32xf32>
    %159 = vector.extract_strided_slice %150 {offsets = [0, 64], sizes = [1, 32], strides = [1, 1]} : vector<1x128xf32> to vector<1x32xf32>
    %160 = math.tanh %159 : vector<1x32xf32>
    %161 = vector.extract_strided_slice %156 {offsets = [0, 96], sizes = [1, 32], strides = [1, 1]} : vector<1x128xf32> to vector<1x32xf32>
    %162 = arith.mulf %158, %145 : vector<1x32xf32>
    %163 = arith.mulf %157, %160 : vector<1x32xf32>
    %164 = arith.addf %162, %163 : vector<1x32xf32>
    %165 = math.tanh %164 : vector<1x32xf32>
    %166 = arith.mulf %161, %165 : vector<1x32xf32>
    %167 = vector.extract_strided_slice %4 {offsets = [7, 0], sizes = [1, 8], strides = [1, 1]} : vector<8x8xf32> to vector<1x8xf32>
    %cst_40 = arith.constant dense<0.000000e+00> : vector<1x128xf32>
    %168 = tpu.matmul %167, %8, %cst_40 {dimension_numbers = #tpu.dot_dimension_numbers<[1], [0], [0], [1], [0, 0, 1, 1], [], []>} : vector<1x8xf32>, vector<8x128xf32>, vector<1x128xf32> -> vector<1x128xf32>
    %169 = arith.addf %168, %9 : vector<1x128xf32>
    %cst_41 = arith.constant 0.000000e+00 : f32
    %170 = vector.broadcast %cst_41 : f32 to vector<1x128xf32>
    %171 = arith.subf %170, %169 : vector<1x128xf32>
    %172 = math.exp %171 : vector<1x128xf32>
    %cst_42 = arith.constant 1.000000e+00 : f32
    %173 = vector.broadcast %cst_42 : f32 to vector<1x128xf32>
    %174 = arith.addf %173, %172 : vector<1x128xf32>
    %175 = tpu.reciprocal %174 {approx = true} : vector<1x128xf32> -> vector<1x128xf32>
    %176 = vector.extract_strided_slice %175 {offsets = [0, 0], sizes = [1, 32], strides = [1, 1]} : vector<1x128xf32> to vector<1x32xf32>
    %177 = vector.extract_strided_slice %169 {offsets = [0, 64], sizes = [1, 32], strides = [1, 1]} : vector<1x128xf32> to vector<1x32xf32>
    %178 = math.tanh %177 : vector<1x32xf32>
    %179 = vector.extract_strided_slice %175 {offsets = [0, 96], sizes = [1, 32], strides = [1, 1]} : vector<1x128xf32> to vector<1x32xf32>
    %180 = arith.mulf %176, %178 : vector<1x32xf32>
    %181 = math.tanh %180 : vector<1x32xf32>
    %182 = arith.mulf %179, %181 : vector<1x32xf32>
    %183 = math.tanh %166 : vector<1x32xf32>
    %184 = math.tanh %182 : vector<1x32xf32>
    %c96 = arith.constant 96 : index
    %c0_43 = arith.constant 0 : index
    %185 = vector.load %arg2[%c96, %c0_43] : memref<304x128xf32, #tpu.memory_space<vmem>>, vector<32x128xf32>
    %cst_44 = arith.constant dense<0.000000e+00> : vector<1x128xf32>
    %186 = tpu.matmul %183, %185, %cst_44 {dimension_numbers = #tpu.dot_dimension_numbers<[1], [0], [0], [1], [0, 0, 1, 1], [], []>} : vector<1x32xf32>, vector<32x128xf32>, vector<1x128xf32> -> vector<1x128xf32>
    %c128 = arith.constant 128 : index
    %c0_45 = arith.constant 0 : index
    %187 = vector.load %arg2[%c128, %c0_45] : memref<304x128xf32, #tpu.memory_space<vmem>>, vector<32x128xf32>
    %cst_46 = arith.constant dense<0.000000e+00> : vector<1x128xf32>
    %188 = tpu.matmul %184, %187, %cst_46 {dimension_numbers = #tpu.dot_dimension_numbers<[1], [0], [0], [1], [0, 0, 1, 1], [], []>} : vector<1x32xf32>, vector<32x128xf32>, vector<1x128xf32> -> vector<1x128xf32>
    %189 = arith.addf %186, %188 : vector<1x128xf32>
    %c160 = arith.constant 160 : index
    %c0_47 = arith.constant 0 : index
    %190 = vector.load %arg2[%c160, %c0_47] : memref<304x128xf32, #tpu.memory_space<vmem>>, vector<1x128xf32>
    %191 = arith.addf %189, %190 : vector<1x128xf32>
    %cst_48 = arith.constant 0.000000e+00 : f32
    %192 = vector.broadcast %cst_48 : f32 to vector<1x128xf32>
    %193 = arith.maximumf %191, %192 : vector<1x128xf32>
    %c168 = arith.constant 168 : index
    %c0_49 = arith.constant 0 : index
    %194 = vector.load %arg2[%c168, %c0_49] : memref<304x128xf32, #tpu.memory_space<vmem>>, vector<128x128xf32>
    %cst_50 = arith.constant dense<0.000000e+00> : vector<1x128xf32>
    %195 = tpu.matmul %193, %194, %cst_50 {dimension_numbers = #tpu.dot_dimension_numbers<[1], [0], [0], [1], [0, 0, 1, 1], [], []>} : vector<1x128xf32>, vector<128x128xf32>, vector<1x128xf32> -> vector<1x128xf32>
    %c296 = arith.constant 296 : index
    %c0_51 = arith.constant 0 : index
    %196 = vector.load %arg2[%c296, %c0_51] : memref<304x128xf32, #tpu.memory_space<vmem>>, vector<1x128xf32>
    %197 = arith.addf %195, %196 : vector<1x128xf32>
    %c0_52 = arith.constant 0 : index
    %c0_53 = arith.constant 0 : index
    %198 = vector.load %arg4[%c0_52, %c0_53] : memref<1x128xf32, #tpu.memory_space<vmem>>, vector<1x128xf32>
    tpu.vector_store %arg4[%c0_52, %c0_53], %197 {strides = array<i32>} : memref<1x128xf32, #tpu.memory_space<vmem>>, vector<1x128xf32>,
    return
  }
}

</mosaic_0001>

<bundles_post_ra>
// kernel: adversarial_attacker_forward.1
= control target key start
LH: loop header
LB: loop body
LE: loop exit
PB: predicated region body
PF: predicated region fallthrough
CT: control target
= control target key end

     0   :  { %10 = vsyncpa [#allocation3], 0  ;;  %s1082_s0 = inlined_call_operand.hbm [shape: f32[1,8,8], index: 0, kind: input, shape index: {}]   ;;  %s1083_s1 = inlined_call_operand.hbm [shape: f32[1,8,8], index: 1, kind: input, shape index: {}]   ;;  %s1084_s2 = inlined_call_operand.hbm [shape: f32[304,128], index: 2, kind: input, shape index: {}]   ;;  %s1085_s3 = inlined_call_operand.hbm [shape: f32[1,8,8], index: 3, kind: output, shape index: {0}]   ;;  %s1086_s4 = inlined_call_operand.hbm [shape: f32[1,128], index: 4, kind: output, shape index: {1}]  }
   0x1   :  { %11 = vsyncpa [#allocation6], 0 }
   0x2   :  { %12 = vsyncpa [#allocation4], 0  ;;  %s30_s17 = sshll.u32 %s1083_s1, 4  ;;  %s31_s17 = int_to_ptr.hbm [resolvable:$true] %s30_s17 }
   0x3   :  { %13 = vsyncpa [#allocation10], 0  ;;  %s940_s18 = smov [#allocation5]   ;;  %s19_s22 = sshll.u32 %s1082_s0, 4  ;;  %s20_s22 = int_to_ptr.hbm [resolvable:$true] %s19_s22 }
   0x4   :  { %s32_s19 = sshll.u32 %s940_s18, 4  ;;  %s941_s23 = smov [#allocation2]   ;;  %s33_s19 = int_to_ptr.vmem [resolvable:$true] %s32_s19 }
   0x5   :  { %35 = dma.hbm_to_vmem [thread:$0]  %s31_s17, 128, %s33_s19, [#allocation6]  }
   0x6   :  { %s21_s24 = sshll.u32 %s941_s23, 4  ;;  %s40_s27 = sshll.u32 %s1084_s2, 4  ;;  %s22_s24 = int_to_ptr.vmem [resolvable:$true] %s21_s24  ;;  %s41_s27 = int_to_ptr.hbm [resolvable:$true] %s40_s27 }
   0x7   :  { %24 = dma.hbm_to_vmem [thread:$0]  %s20_s22, 128, %s22_s24, [#allocation3]  }
   0x8   :  { %s942_s1 = smov [#allocation7]   ;;  %s943_s29 = smov 128  }
   0x9   :  { %s42_s28 = sshll.u32 %s942_s1, 4  ;;  %s944_s30 = smov 8   ;;  %s43_s28 = int_to_ptr.vmem [resolvable:$true] %s42_s28 }
   0xa   :  { %48 = dma.hbm_to_vmem [thread:$0]  %s41_s27, 4864, %s43_s28, [#allocation6], %s943_s29, %s943_s29, %s944_s30  }
   0xb   :  { %932 = dma.done.wait [#allocation3], 128  }
   0xc   :  { %933 = vsyncadd [#allocation3], 4294967168 }
   0xd   :  { %934 = dma.done.wait [#allocation6], 4992  }
   0xe   :  { %935 = vsyncadd [#allocation6], 4294962304  ;;  %v66_v0 = vld [vmem:[#allocation7] sm:$0xff]  ;;  %v61_v1 = vld [vmem:[#allocation2] sm:$0xff]  ;;  %vm64_vm0 = vcmask 64512   ;;  %v945_v8 = vmov 0.0  }
   0xf   :  { %v62_v2 = vld [vmem:[#allocation5] sm:$0xff]  ;;  %93 = vmatpush.msra.mxu3 %v66_v0  ;;  %v987_v4 = vld [vmem:[#allocation7 + $0x20] sm:$0xff]  ;;  %v997_v6 = vld [vmem:[#allocation7 + $0x10] sm:$0xff]  ;;  %s946_s0 = smov 64   ;;  %s947_s2 = smov 32   ;;  %vm98_vm1 = vcmask 261120  }
  0x10   :  { %v985_v3 = vadd.f32 %v62_v2, %v61_v1  ;;  %v989_v5 = vld [vmem:[#allocation7 + $0x18] sm:$0xff]  ;;  %114 = vmatpush.msra.mxu1 %v987_v4  ;;  %163 = vmatpush.msra.mxu2 %v987_v4  ;;  %v67_v7 = vld [vmem:[#allocation7 + $0x8] sm:$0xff]  ;;  %s948_s5 = smov 96   ;;  %s949_s6 = smov [#allocation8]  }
  0x11   :  { %219 = vmatpush.msrb.mxu3 %v987_v4  ;;  %v735_v9 = vld [vmem:[#allocation7 + $0x28] ss:$0 sm:$0xff]  ;;  %s684_s7 = sshll.u32 %s949_s6, 4  ;;  %s686_s10 = sshll.u32 %s1085_s3, 4  ;;  %s685_s7 = int_to_ptr.vmem [resolvable:$true] %s684_s7  ;;  %s687_s10 = int_to_ptr.hbm [resolvable:$true] %s686_s10 }
  0x12   :  { %713 = vmatmul.msk.f32.vlgmr.msra.gmra.mxu3 %vm64_vm0, %v985_v3  ;;  %65 = vst.msk [vmem:[#allocation8] sm:$0xff] %vm64_vm0, %v985_v3  ;;  %115 = vmatpush.msra.mxu1 %v989_v5  ;;  %s950_s11 = smov [#allocation9]   ;;  %s697_s15 = sshll.u32 %s1086_s4, 4  ;;  %s698_s15 = int_to_ptr.hbm [resolvable:$true] %s697_s15 }
  0x13   :  { %164 = vmatpush.msra.mxu2 %v989_v5  ;;  %220 = vmatpush.msrb.mxu3 %v989_v5  ;;  %689 = dma.vmem_to_hbm [thread:$0]  %s685_s7, 128, %s687_s10, [#allocation4]  }
  0x14   :  { %116 = vmatpush.msra.mxu1 %v997_v6  ;;  %s695_s12 = sshll.u32 %s950_s11, 4  ;;  %s696_s12 = int_to_ptr.vmem [resolvable:$true] %s695_s12 }
  0x15   :  { %165 = vmatpush.msra.mxu2 %v997_v6  ;;  %221 = vmatpush.msrb.mxu3 %v997_v6 }
  0x16   :  { %117 = vmatpush.msra.mxu1 %v67_v7 }
  0x17   :  { %166 = vmatpush.msra.mxu2 %v67_v7  ;;  %118 = vmatmul.f32.vlgmr.msra.gmra.mxu1 %v945_v8 }
  0x18   :  { %275 = vmatpush.msrb.mxu1 %v987_v4  ;;  %222 = vmatpush.msrb.mxu3 %v67_v7 }
  0x19   :  { %387 = vmatpush.msrb.mxu2 %v987_v4 }
  0x1a   :  { %276 = vmatpush.msrb.mxu1 %v989_v5  ;;  %443 = vmatpush.msra.mxu3 %v987_v4 }
  0x1b   :  { %388 = vmatpush.msrb.mxu2 %v989_v5 }
  0x1c   :  { %277 = vmatpush.msrb.mxu1 %v997_v6  ;;  %444 = vmatpush.msra.mxu3 %v989_v5 }
  0x1d   :  { %389 = vmatpush.msrb.mxu2 %v997_v6 }
  0x1e   :  { %278 = vmatpush.msrb.mxu1 %v67_v7  ;;  %445 = vmatpush.msra.mxu3 %v997_v6 }
  0x1f   :  { %390 = vmatpush.msrb.mxu2 %v67_v7 }
  0x20   :  { %331 = vmatpush.msra.mxu1 %v987_v4  ;;  %446 = vmatpush.msra.mxu3 %v67_v7 }
  0x22   :  { %332 = vmatpush.msra.mxu1 %v989_v5 }
  0x24   :  { %333 = vmatpush.msra.mxu1 %v997_v6 }
  0x26   :  { %334 = vmatpush.msra.mxu1 %v67_v7 }
  0x94   :  { %v119_v11 = vpop.f32.mrf.mxu1 }
  0x95   :  { %v95_v10 = vpop.f32.mrf.mxu3 }
  0x96   :  { %v1018_v12 = vadd.f32 %v735_v9, %v95_v10 }
  0x98   :  { %v122_v13 = vadd.f32 %v119_v11, %v1018_v12 }
  0x9a   :  { %736 = vtanh.f32 %v122_v13  ;;  %v123_v15 = vsub.f32 0.0, %v122_v13 }
  0x9c   :  { %v124_v16 = vmul.f32 1.442695, %v123_v15 }
  0x9e   :  { %738 = vpow2.f32 %v124_v16 }
  0xa0   :  { %v737_v14 = vpop.eup %736 }
  0xa1   :  { %131 = vrot.lane.b32.xlu0 %v737_v14, %s946_s0 }
  0xa4   :  { %v739_v17 = vpop.eup %738 }
  0xa5   :  { %v126_v18 = vadd.f32 1.0, %v739_v17 }
  0xa7   :  { %740 = vrcp.f32 %v126_v18 }
  0xad   :  { %v741_v19 = vpop.eup %740 }
  0xae   :  { %v129_v22 = vmul.f32 0.0, %v741_v19 }
 0x113   :  { %v132_v20 = vpop.permute.xlu0 %131 }
 0x114   :  { %v134_v21 = vmul.f32 %v741_v19, %v132_v20 }
 0x116   :  { %136 = vrot.lane.b32.xlu0 %v134_v21, %s947_s2 }
 0x188   :  { %v137_v23 = vpop.permute.xlu0 %136 }
 0x189   :  { %v139_v24 = vadd.f32 %v137_v23, %v129_v22 }
 0x18b   :  { %742 = vtanh.f32 %v139_v24  ;;  %v182_v40 = vrot.slane %v139_v24, 7 }
 0x191   :  { %v743_v25 = vpop.eup %742 }
 0x192   :  { %142 = vrot.lane.b32.xlu1 %v743_v25, %s946_s0 }
 0x204   :  { %v143_v26 = vpop.permute.xlu1 %142 }
 0x205   :  { %v145_v27 = vmul.f32 %v741_v19, %v143_v26 }
 0x207   :  { %147 = vrot.lane.b32.xlu1 %v145_v27, %s947_s2 }
 0x279   :  { %v148_v28 = vpop.permute.xlu1 %147 }
 0x27a   :  { %714 = vmatmul.msk.f32.vlgmr.msra.gmra.mxu2 %vm98_vm1, %v148_v28 }
 0x27b   :  { %499 = vmatpush.msra.mxu2 %v987_v4 }
 0x27d   :  { %500 = vmatpush.msra.mxu2 %v989_v5 }
 0x27f   :  { %501 = vmatpush.msra.mxu2 %v997_v6 }
 0x281   :  { %502 = vmatpush.msra.mxu2 %v67_v7 }
 0x2fd   :  { %v168_v29 = vpop.f32.mrf.mxu2 }
 0x2fe   :  { %v172_v30 = vrot.slane %v168_v29, 7 }
 0x300   :  { %v174_v31 = vadd.f32 %v172_v30, %v1018_v12 }
 0x302   :  { %744 = vtanh.f32 %v174_v31  ;;  %v175_v33 = vsub.f32 0.0, %v174_v31 }
 0x304   :  { %v176_v34 = vmul.f32 1.442695, %v175_v33 }
 0x306   :  { %746 = vpow2.f32 %v176_v34 }
 0x308   :  { %v745_v32 = vpop.eup %744 }
 0x309   :  { %186 = vrot.lane.b32.xlu2 %v745_v32, %s946_s0 }
 0x30c   :  { %v747_v35 = vpop.eup %746 }
 0x30d   :  { %v178_v36 = vadd.f32 1.0, %v747_v35 }
 0x30f   :  { %748 = vrcp.f32 %v178_v36 }
 0x315   :  { %v749_v37 = vpop.eup %748 }
 0x316   :  { %v184_v41 = vmul.f32 %v749_v37, %v182_v40 }
 0x363   :  { %v187_v38 = vpop.permute.xlu2 %186 }
 0x364   :  { %v189_v39 = vmul.f32 %v749_v37, %v187_v38 }
 0x366   :  { %191 = vrot.lane.b32.xlu2 %v189_v39, %s947_s2 }
 0x3c0   :  { %v192_v42 = vpop.permute.xlu2 %191 }
 0x3c1   :  { %v194_v43 = vadd.f32 %v192_v42, %v184_v41 }
 0x3c3   :  { %750 = vtanh.f32 %v194_v43  ;;  %v238_v60 = vrot.slane %v194_v43, 7 }
 0x3c9   :  { %v751_v44 = vpop.eup %750 }
 0x3ca   :  { %197 = vrot.lane.b32.xlu0 %v751_v44, %s946_s0 }
 0x43c   :  { %v198_v45 = vpop.permute.xlu0 %197 }
 0x43d   :  { %v200_v46 = vmul.f32 %v749_v37, %v198_v45 }
 0x43f   :  { %v202_v47 = vrot.slane %v200_v46, 1 }
 0x441   :  { %203 = vrot.lane.b32.xlu1 %v202_v47, %s947_s2 }
 0x4b3   :  { %v204_v48 = vpop.permute.xlu1 %203 }
 0x4b4   :  { %715 = vmatmul.msk.f32.vlgmr.msrb.gmra.mxu3 %vm98_vm1, %v204_v48 }
 0x537   :  { %v224_v49 = vpop.f32.mrf.mxu3 }
 0x538   :  { %v228_v50 = vrot.slane %v224_v49, 6 }
 0x53a   :  { %v230_v51 = vadd.f32 %v228_v50, %v1018_v12 }
 0x53c   :  { %752 = vtanh.f32 %v230_v51  ;;  %v231_v53 = vsub.f32 0.0, %v230_v51 }
 0x53e   :  { %v232_v54 = vmul.f32 1.442695, %v231_v53 }
 0x540   :  { %754 = vpow2.f32 %v232_v54 }
 0x542   :  { %v753_v52 = vpop.eup %752 }
 0x543   :  { %242 = vrot.lane.b32.xlu2 %v753_v52, %s946_s0 }
 0x546   :  { %v755_v55 = vpop.eup %754 }
 0x547   :  { %v234_v56 = vadd.f32 1.0, %v755_v55 }
 0x549   :  { %756 = vrcp.f32 %v234_v56 }
 0x54f   :  { %v757_v57 = vpop.eup %756 }
 0x550   :  { %v240_v61 = vmul.f32 %v757_v57, %v238_v60 }
 0x59d   :  { %v243_v58 = vpop.permute.xlu2 %242 }
 0x59e   :  { %v245_v59 = vmul.f32 %v757_v57, %v243_v58 }
 0x5a0   :  { %247 = vrot.lane.b32.xlu0 %v245_v59, %s947_s2 }
 0x612   :  { %v248_v62 = vpop.permute.xlu0 %247 }
 0x613   :  { %v250_v63 = vadd.f32 %v248_v62, %v240_v61 }
 0x615   :  { %758 = vtanh.f32 %v250_v63  ;;  %v294_v18 = vrot.slane %v250_v63, 7 }
 0x61b   :  { %v759_v0 = vpop.eup %758 }
 0x61c   :  { %253 = vrot.lane.b32.xlu1 %v759_v0, %s946_s0 }
 0x68e   :  { %v254_v1 = vpop.permute.xlu1 %253 }
 0x68f   :  { %v256_v2 = vmul.f32 %v757_v57, %v254_v1 }
 0x691   :  { %v258_v4 = vrot.slane %v256_v2, 2 }
 0x693   :  { %259 = vrot.lane.b32.xlu2 %v258_v4, %s947_s2 }
 0x6ed   :  { %v260_v5 = vpop.permute.xlu2 %259 }
 0x6ee   :  { %716 = vmatmul.msk.f32.vlgmr.msrb.gmra.mxu1 %vm98_vm1, %v260_v5 }
 0x76b   :  { %v280_v6 = vpop.f32.mrf.mxu1 }
 0x76c   :  { %v284_v7 = vrot.slane %v280_v6, 5 }
 0x76e   :  { %v286_v8 = vadd.f32 %v284_v7, %v1018_v12 }
 0x770   :  { %760 = vtanh.f32 %v286_v8  ;;  %v287_v10 = vsub.f32 0.0, %v286_v8 }
 0x772   :  { %v288_v11 = vmul.f32 1.442695, %v287_v10 }
 0x774   :  { %762 = vpow2.f32 %v288_v11 }
 0x776   :  { %v761_v9 = vpop.eup %760 }
 0x777   :  { %298 = vrot.lane.b32.xlu0 %v761_v9, %s946_s0 }
 0x77a   :  { %v763_v13 = vpop.eup %762 }
 0x77b   :  { %v290_v14 = vadd.f32 1.0, %v763_v13 }
 0x77d   :  { %764 = vrcp.f32 %v290_v14 }
 0x783   :  { %v765_v15 = vpop.eup %764 }
 0x784   :  { %v296_v19 = vmul.f32 %v765_v15, %v294_v18 }
 0x7e9   :  { %v299_v16 = vpop.permute.xlu0 %298 }
 0x7ea   :  { %v301_v17 = vmul.f32 %v765_v15, %v299_v16 }
 0x7ec   :  { %303 = vrot.lane.b32.xlu1 %v301_v17, %s947_s2 }
 0x85e   :  { %v304_v20 = vpop.permute.xlu1 %303 }
 0x85f   :  { %v306_v21 = vadd.f32 %v304_v20, %v296_v19 }
 0x861   :  { %766 = vtanh.f32 %v306_v21  ;;  %v350_v38 = vrot.slane %v306_v21, 7 }
 0x867   :  { %v767_v22 = vpop.eup %766 }
 0x868   :  { %309 = vrot.lane.b32.xlu2 %v767_v22, %s946_s0 }
 0x8c2   :  { %v310_v23 = vpop.permute.xlu2 %309 }
 0x8c3   :  { %v312_v24 = vmul.f32 %v765_v15, %v310_v23 }
 0x8c5   :  { %v314_v25 = vrot.slane %v312_v24, 3  ;;  %v537_v24 = vrot.slane %v985_v3, 7 }
 0x8c7   :  { %315 = vrot.lane.b32.xlu0 %v314_v25, %s947_s2  ;;  %v72_v25 = vld [vmem:[#allocation7 + $0x30] sm:$0xff] }
 0x8c8   :  { %555 = vmatpush.msrb.mxu1 %v72_v25 }
 0x939   :  { %v316_v26 = vpop.permute.xlu0 %315 }
 0x93a   :  { %717 = vmatmul.msk.f32.vlgmr.msra.gmra.mxu1 %vm98_vm1, %v316_v26 }
 0x942   :  { %721 = vmatmul.msk.f32.vlgmr.msrb.gmra.mxu1 %vm64_vm0, %v537_v24 }
 0x9b7   :  { %v336_v27 = vpop.f32.mrf.mxu1 }
 0x9b8   :  { %v340_v28 = vrot.slane %v336_v27, 4  ;;  %v73_v27 = vld [vmem:[#allocation7 + $0x58] sm:$0x1] }
 0x9ba   :  { %v342_v29 = vadd.f32 %v340_v28, %v1018_v12 }
 0x9bc   :  { %768 = vtanh.f32 %v342_v29  ;;  %v343_v31 = vsub.f32 0.0, %v342_v29 }
 0x9be   :  { %v344_v32 = vmul.f32 1.442695, %v343_v31 }
 0x9bf   :  { %v557_v28 = vpop.f32.mrf.mxu1 }
 0x9c0   :  { %770 = vpow2.f32 %v344_v32  ;;  %v558_v29 = vadd.f32 %v557_v28, %v73_v27 }
 0x9c2   :  { %v769_v30 = vpop.eup %768 }
 0x9c3   :  { %354 = vrot.lane.b32.xlu1 %v769_v30, %s946_s0 }
 0x9c6   :  { %v771_v33 = vpop.eup %770 }
 0x9c7   :  { %v346_v34 = vadd.f32 1.0, %v771_v33 }
 0x9c9   :  { %772 = vrcp.f32 %v346_v34  ;;  %v560_v34 = vsub.f32 0.0, %v558_v29 }
 0x9cf   :  { %v773_v35 = vpop.eup %772 }
 0x9d0   :  { %v352_v39 = vmul.f32 %v773_v35, %v350_v38 }
 0xa35   :  { %v355_v36 = vpop.permute.xlu1 %354 }
 0xa36   :  { %v357_v37 = vmul.f32 %v773_v35, %v355_v36 }
 0xa38   :  { %359 = vrot.lane.b32.xlu2 %v357_v37, %s947_s2 }
 0xa92   :  { %v360_v40 = vpop.permute.xlu2 %359 }
 0xa93   :  { %v362_v41 = vadd.f32 %v360_v40, %v352_v39 }
 0xa95   :  { %774 = vtanh.f32 %v362_v41  ;;  %v406_v58 = vrot.slane %v362_v41, 7 }
 0xa9b   :  { %v775_v42 = vpop.eup %774 }
 0xa9c   :  { %365 = vrot.lane.b32.xlu0 %v775_v42, %s946_s0 }
 0xb0e   :  { %v366_v43 = vpop.permute.xlu0 %365 }
 0xb0f   :  { %v368_v44 = vmul.f32 %v773_v35, %v366_v43  ;;  %v561_v35 = vmul.f32 1.442695, %v560_v34 }
 0xb11   :  { %v370_v45 = vrot.slane %v368_v44, 4 }
 0xb13   :  { %371 = vrot.lane.b32.xlu1 %v370_v45, %s947_s2 }
 0xb85   :  { %v372_v46 = vpop.permute.xlu1 %371 }
 0xb86   :  { %718 = vmatmul.msk.f32.vlgmr.msrb.gmra.mxu2 %vm98_vm1, %v372_v46 }
 0xc09   :  { %v392_v47 = vpop.f32.mrf.mxu2 }
 0xc0a   :  { %v396_v48 = vrot.slane %v392_v47, 3 }
 0xc0c   :  { %v398_v49 = vadd.f32 %v396_v48, %v1018_v12 }
 0xc0e   :  { %776 = vtanh.f32 %v398_v49  ;;  %v399_v51 = vsub.f32 0.0, %v398_v49 }
 0xc10   :  { %v400_v52 = vmul.f32 1.442695, %v399_v51 }
 0xc12   :  { %778 = vpow2.f32 %v400_v52 }
 0xc14   :  { %v777_v50 = vpop.eup %776 }
 0xc15   :  { %410 = vrot.lane.b32.xlu2 %v777_v50, %s946_s0 }
 0xc18   :  { %v779_v53 = vpop.eup %778 }
 0xc19   :  { %v402_v54 = vadd.f32 1.0, %v779_v53 }
 0xc1b   :  { %780 = vrcp.f32 %v402_v54 }
 0xc21   :  { %v781_v55 = vpop.eup %780 }
 0xc22   :  { %v408_v59 = vmul.f32 %v781_v55, %v406_v58  ;;  %v584_v58 = vld [vmem:[#allocation7 + $0x88] sm:$0xff] }
 0xc6f   :  { %v411_v56 = vpop.permute.xlu2 %410 }
 0xc70   :  { %v413_v57 = vmul.f32 %v781_v55, %v411_v56  ;;  %v586_v56 = vld [vmem:[#allocation7 + $0x98] sm:$0xff] }
 0xc71   :  { %604 = vmatpush.msrb.mxu2 %v586_v56 }
 0xc72   :  { %415 = vrot.lane.b32.xlu0 %v413_v57, %s947_s2  ;;  %v585_v57 = vld [vmem:[#allocation7 + $0x90] sm:$0xff] }
 0xc73   :  { %605 = vmatpush.msrb.mxu2 %v585_v57 }
 0xc75   :  { %606 = vmatpush.msrb.mxu2 %v584_v58 }
 0xce4   :  { %v416_v60 = vpop.permute.xlu0 %415 }
 0xce5   :  { %v418_v61 = vadd.f32 %v416_v60, %v408_v59  ;;  %v583_v59 = vld [vmem:[#allocation7 + $0x80] sm:$0xff]  ;;  %v582_v60 = vld [vmem:[#allocation7 + $0x78] sm:$0xff] }
 0xce6   :  { %607 = vmatpush.msrb.mxu2 %v583_v59  ;;  %630 = vmatpush.msrb.mxu3 %v582_v60 }
 0xce7   :  { %782 = vtanh.f32 %v418_v61  ;;  %v462_v16 = vrot.slane %v418_v61, 7  ;;  %v581_v61 = vld [vmem:[#allocation7 + $0x70] sm:$0xff] }
 0xce8   :  { %631 = vmatpush.msrb.mxu3 %v581_v61 }
 0xced   :  { %v783_v62 = vpop.eup %782 }
 0xcee   :  { %421 = vrot.lane.b32.xlu1 %v783_v62, %s946_s0  ;;  %v580_v62 = vld [vmem:[#allocation7 + $0x68] sm:$0xff] }
 0xcef   :  { %632 = vmatpush.msrb.mxu3 %v580_v62 }
 0xd60   :  { %v422_v63 = vpop.permute.xlu1 %421 }
 0xd61   :  { %v424_v0 = vmul.f32 %v781_v55, %v422_v63  ;;  %v579_v63 = vld [vmem:[#allocation7 + $0x60] sm:$0xff] }
 0xd62   :  { %633 = vmatpush.msrb.mxu3 %v579_v63 }
 0xd63   :  { %v426_v1 = vrot.slane %v424_v0, 5 }
 0xd65   :  { %427 = vrot.lane.b32.xlu2 %v426_v1, %s947_s2 }
 0xdbf   :  { %v428_v2 = vpop.permute.xlu2 %427 }
 0xdc0   :  { %719 = vmatmul.msk.f32.vlgmr.msra.gmra.mxu3 %vm98_vm1, %v428_v2 }
 0xe43   :  { %v448_v4 = vpop.f32.mrf.mxu3 }
 0xe44   :  { %v452_v5 = vrot.slane %v448_v4, 2 }
 0xe46   :  { %v454_v6 = vadd.f32 %v452_v5, %v1018_v12 }
 0xe48   :  { %784 = vtanh.f32 %v454_v6  ;;  %v455_v8 = vsub.f32 0.0, %v454_v6  ;;  %v656_v6 = vld [vmem:[#allocation7 + $0x120] sm:$0xff] }
 0xe49   :  { %658 = vmatpush.msra.mxu0 %v656_v6 }
 0xe4a   :  { %v456_v9 = vmul.f32 1.442695, %v455_v8  ;;  %v654_v8 = vld [vmem:[#allocation7 + $0x110] sm:$0xff] }
 0xe4c   :  { %786 = vpow2.f32 %v456_v9  ;;  %v653_v9 = vld [vmem:[#allocation7 + $0x108] sm:$0xff] }
 0xe4e   :  { %v785_v7 = vpop.eup %784 }
 0xe4f   :  { %466 = vrot.lane.b32.xlu0 %v785_v7, %s946_s0  ;;  %v655_v7 = vld [vmem:[#allocation7 + $0x118] sm:$0xff] }
 0xe50   :  { %659 = vmatpush.msra.mxu0 %v655_v7 }
 0xe52   :  { %v787_v10 = vpop.eup %786  ;;  %660 = vmatpush.msra.mxu0 %v654_v8 }
 0xe53   :  { %v458_v11 = vadd.f32 1.0, %v787_v10  ;;  %v652_v10 = vld [vmem:[#allocation7 + $0x100] sm:$0xff] }
 0xe54   :  { %661 = vmatpush.msra.mxu0 %v653_v9 }
 0xe55   :  { %788 = vrcp.f32 %v458_v11  ;;  %v651_v11 = vld [vmem:[#allocation7 + $0xf8] sm:$0xff] }
 0xe56   :  { %662 = vmatpush.msra.mxu0 %v652_v10 }
 0xe58   :  { %663 = vmatpush.msra.mxu0 %v651_v11 }
 0xe5b   :  { %v789_v13 = vpop.eup %788 }
 0xe5c   :  { %v464_v17 = vmul.f32 %v789_v13, %v462_v16  ;;  %v647_v16 = vld [vmem:[#allocation7 + $0xd8] sm:$0xff] }
 0xec1   :  { %v467_v14 = vpop.permute.xlu0 %466 }
 0xec2   :  { %v469_v15 = vmul.f32 %v789_v13, %v467_v14  ;;  %v649_v14 = vld [vmem:[#allocation7 + $0xe8] sm:$0xff] }
 0xec4   :  { %471 = vrot.lane.b32.xlu1 %v469_v15, %s947_s2  ;;  %v648_v15 = vld [vmem:[#allocation7 + $0xe0] sm:$0xff] }
 0xf36   :  { %v472_v18 = vpop.permute.xlu1 %471 }
 0xf37   :  { %v474_v19 = vadd.f32 %v472_v18, %v464_v17  ;;  %v646_v18 = vld [vmem:[#allocation7 + $0xd0] sm:$0xff] }
 0xf39   :  { %790 = vtanh.f32 %v474_v19  ;;  %v518_v48 = vrot.slane %v474_v19, 7  ;;  %v645_v19 = vld [vmem:[#allocation7 + $0xc8] sm:$0xff] }
 0xf3a   :  { %792 = vtanh.f32 %v558_v29 }
 0xf3f   :  { %v791_v20 = vpop.eup %790 }
 0xf40   :  { %477 = vrot.lane.b32.xlu2 %v791_v20, %s946_s0  ;;  %v793_v30 = vpop.eup %792  ;;  %v644_v20 = vld [vmem:[#allocation7 + $0xc0] sm:$0xff] }
 0xf9a   :  { %v478_v21 = vpop.permute.xlu2 %477 }
 0xf9b   :  { %v480_v22 = vmul.f32 %v789_v13, %v478_v21  ;;  %v650_v13 = vld [vmem:[#allocation7 + $0xf0] sm:$0xff]  ;;  %v643_v21 = vld [vmem:[#allocation7 + $0xb8] sm:$0xff] }
 0xf9c   :  { %664 = vmatpush.msra.mxu0 %v650_v13 }
 0xf9d   :  { %v482_v23 = vrot.slane %v480_v22, 6  ;;  %v642_v22 = vld [vmem:[#allocation7 + $0xb0] sm:$0xff] }
 0xf9e   :  { %665 = vmatpush.msra.mxu0 %v649_v14 }
 0xf9f   :  { %483 = vrot.lane.b32.xlu0 %v482_v23, %s947_s2  ;;  %v641_v23 = vld [vmem:[#allocation7 + $0xa8] sm:$0xff] }
 0xfa0   :  { %666 = vmatpush.msra.mxu0 %v648_v15 }
 0xfa2   :  { %667 = vmatpush.msra.mxu0 %v647_v16 }
 0xfa4   :  { %668 = vmatpush.msra.mxu0 %v646_v18 }
 0xfa6   :  { %669 = vmatpush.msra.mxu0 %v645_v19 }
 0xfa7   :  { %567 = vrot.lane.b32.xlu0 %v793_v30, %s946_s0  ;;  %v657_v30 = vld [vmem:[#allocation7 + $0x128] sm:$0x1] }
 0xfa8   :  { %670 = vmatpush.msra.mxu0 %v644_v20 }
 0xfaa   :  { %671 = vmatpush.msra.mxu0 %v643_v21 }
 0xfac   :  { %672 = vmatpush.msra.mxu0 %v642_v22 }
 0xfae   :  { %673 = vmatpush.msra.mxu0 %v641_v23 }
0x1011   :  { %v484_v26 = vpop.permute.xlu0 %483 }
0x1012   :  { %720 = vmatmul.msk.f32.vlgmr.msra.gmra.mxu2 %vm98_vm1, %v484_v26  ;;  %v638_v26 = vld [vmem:[#allocation7 + $0xa0] sm:$0x1] }
0x1019   :  { %v568_v43 = vpop.permute.xlu0 %567 }
0x1095   :  { %v504_v31 = vpop.f32.mrf.mxu2 }
0x1096   :  { %v508_v32 = vrot.slane %v504_v31, 1 }
0x1098   :  { %v510_v33 = vadd.f32 %v508_v32, %v1018_v12 }
0x109a   :  { %794 = vtanh.f32 %v510_v33  ;;  %v511_v36 = vsub.f32 0.0, %v510_v33 }
0x109b   :  { %796 = vpow2.f32 %v561_v35 }
0x109c   :  { %v512_v37 = vmul.f32 1.442695, %v511_v36 }
0x109e   :  { %798 = vpow2.f32 %v512_v37 }
0x10a0   :  { %v795_v3 = vpop.eup %794 }
0x10a1   :  { %522 = vrot.lane.b32.xlu1 %v795_v3, %s946_s0  ;;  %v797_v38 = vpop.eup %796 }
0x10a2   :  { %v563_v39 = vadd.f32 1.0, %v797_v38 }
0x10a4   :  { %v799_v40 = vpop.eup %798  ;;  %800 = vrcp.f32 %v563_v39 }
0x10a5   :  { %v514_v41 = vadd.f32 1.0, %v799_v40 }
0x10a7   :  { %802 = vrcp.f32 %v514_v41 }
0x10aa   :  { %v801_v42 = vpop.eup %800 }
0x10ab   :  { %v570_v44 = vmul.f32 %v801_v42, %v568_v43 }
0x10ad   :  { %v803_v12 = vpop.eup %802  ;;  %804 = vtanh.f32 %v570_v44 }
0x10ae   :  { %v520_v49 = vmul.f32 %v803_v12, %v518_v48 }
0x10b3   :  { %v805_v47 = vpop.eup %804 }
0x1113   :  { %v523_v45 = vpop.permute.xlu1 %522 }
0x1114   :  { %v525_v46 = vmul.f32 %v803_v12, %v523_v45 }
0x1116   :  { %527 = vrot.lane.b32.xlu2 %v525_v46, %s947_s2 }
0x111e   :  { %573 = vrot.lane.b32.xlu2 %v805_v47, %s948_s5 }
0x1170   :  { %v528_v50 = vpop.permute.xlu2 %527 }
0x1171   :  { %v530_v51 = vadd.f32 %v528_v50, %v520_v49 }
0x1173   :  { %806 = vtanh.f32 %v530_v51 }
0x1178   :  { %v574_v52 = vpop.permute.xlu2 %573 }
0x1179   :  { %v807_v53 = vpop.eup %806  ;;  %v576_v54 = vmul.f32 %v801_v42, %v574_v52 }
0x117a   :  { %533 = vrot.lane.b32.xlu1 %v807_v53, %s946_s0 }
0x117b   :  { %808 = vtanh.f32 %v576_v54 }
0x1181   :  { %v809_v55 = vpop.eup %808 }
0x1182   :  { %588 = vrot.lane.b32.xlu0 %v809_v55, %s947_s2 }
0x11ec   :  { %v534_v0 = vpop.permute.xlu1 %533 }
0x11ed   :  { %v536_v1 = vmul.f32 %v803_v12, %v534_v0 }
0x11ef   :  { %810 = vtanh.f32 %v536_v1 }
0x11f4   :  { %v589_v2 = vpop.permute.xlu0 %588 }
0x11f5   :  { %v811_v4 = vpop.eup %810  ;;  %722 = vmatmul.msk.f32.vlgmr.msrb.gmra.mxu2 %vm98_vm1, %v589_v2 }
0x11f6   :  { %v613_v5 = vrot.slane %v811_v4, 7 }
0x11f8   :  { %614 = vrot.lane.b32.xlu1 %v613_v5, %s947_s2 }
0x126a   :  { %v615_v17 = vpop.permute.xlu1 %614 }
0x126b   :  { %723 = vmatmul.msk.f32.vlgmr.msrb.gmra.mxu3 %vm98_vm1, %v615_v17 }
0x1278   :  { %v609_v24 = vpop.f32.mrf.mxu2 }
0x12ee   :  { %v635_v25 = vpop.f32.mrf.mxu3 }
0x12ef   :  { %v636_v27 = vadd.f32 %v635_v25, %v609_v24 }
0x12f1   :  { %v639_v28 = vadd.f32 %v638_v26, %v636_v27 }
0x12f3   :  { %v640_v29 = vmax.f32 %v639_v28, 0.0 }
0x12f5   :  { %674 = vmatmul.f32.vlgmr.msra.gmra.mxu0 %v640_v29 }
0x1372   :  { %v675_v31 = vpop.f32.mrf.mxu0 }
0x1373   :  { %v676_v32 = vadd.f32 %v675_v31, %v657_v30 }
0x1375   :  { %678 = vst [vmem:[#allocation9] sm:$0x1] %v676_v32 }
0x1376   :  { %700 = dma.vmem_to_hbm [thread:$0]  %s696_s12, 16, %s698_s15, [#allocation10]  }
0x1377   :  { %936 = dma.done.wait [#allocation4], 128  }
0x1378   :  { %937 = vsyncadd [#allocation4], 4294967168 }
0x1379   :  { %938 = dma.done.wait [#allocation10], 16  }
0x137a   :  { %939 = vsyncadd [#allocation10], 4294967280 }
0x137b   :  { %709 = vsyncpa [#allocation3], 1 }
0x137c   :  { %710 = vsyncpa [#allocation6], 1 }
0x137d   :  { %711 = vsyncpa [#allocation4], 1 }
0x137e   :  { %712 = vsyncpa [#allocation10], 1 }

</bundles_post_ra>
